<compile_context>
chip_gen: v6e
topology: v6e:2x2x1
jax: 0.10.0
libtpu: 0.0.40
codegen_flags: <defaults>
</compile_context>

<pallas_src>
import jax
import jax.numpy as jnp
from jax.experimental import pallas as pl
from jax.experimental.pallas import tpu as pltpu


def _ce_row_loss_kernel(logits_ref, targets_ref, loss_ref):
    """Per-row cross-entropy loss for one (tile_rows, C_pad) tile.

    logits_ref : (TR, Cp) input dtype, VMEM
    targets_ref: (TR, 1)  int32,       VMEM
    loss_ref   : (TR, 1)  float32,     VMEM
    """
    x = logits_ref[...].astype(jnp.float32)                  # (TR, Cp)
    tgt = targets_ref[...]                                   # (TR, 1)

    # Single shifted copy; both the log-sum-exp and the picked logit come
    # from s, so the unshifted x does not need to stay live.
    m = jnp.max(x, axis=-1, keepdims=True)                   # (TR, 1)
    s = x - m                                                 # (TR, Cp)

    sum_exp = jnp.sum(jnp.exp(s), axis=-1, keepdims=True)    # (TR, 1)
    col = jax.lax.broadcasted_iota(jnp.int32, s.shape, 1)    # (TR, Cp)
    picked = jnp.sum(jnp.where(col == tgt, s, 0.0),
                     axis=-1, keepdims=True)                 # s[row, target]

    loss_ref[...] = jnp.log(sum_exp) - picked                # (TR, 1)


def _round_up(x, m):
    return (x + m - 1) // m * m


def modified_cross_entropy_loss(logits, targets):
    """logits: (B, T, C) float; targets: (B, T) int -> scalar float32 loss."""
    B, T, C = logits.shape
    N = B * T
    in_dtype = logits.dtype
    in_bytes = jnp.dtype(in_dtype).itemsize

    # --- lane-dense class axis (multiple of 128) --------------------------
    C_pad = _round_up(max(C, 128), 128)

    # --- generation-aware VMEM budget --------------------------------------
    try:
        vmem_phys = pltpu.get_tpu_info().vmem_capacity_bytes
    except Exception:
        vmem_phys = 64 * 1024 * 1024  # conservative (v7x per-core) fallback
    vmem_limit = int(min(vmem_phys * 3 // 4, 96 * 1024 * 1024))

    # --- row tile sizing ----------------------------------------------------
    # sublane granularity: 8 for 4-byte dtypes, 16 for packed 2-byte dtypes
    base = 8 if in_bytes >= 4 else 16
    # double-buffered logits stream + ~4 f32 temporaries per element
    per_row_bytes = C_pad * (2 * in_bytes + 4 * 4)
    budget = vmem_limit // 2
    rows_fit = max(base, (budget // per_row_bytes) // base * base)
    tile_rows = int(min(1024, rows_fit, _round_up(N, base)))
    N_pad = _round_up(N, tile_rows)
    num_tiles = N_pad // tile_rows

    # --- pad inputs (padded rows get target 0; they are sliced off later) ---
    pad_val = jnp.finfo(in_dtype).min
    logits_p = jnp.pad(logits.reshape(N, C),
                       ((0, N_pad - N), (0, C_pad - C)),
                       constant_values=pad_val)
    targets_p = jnp.pad(targets.reshape(N).astype(jnp.int32),
                        (0, N_pad - N)).reshape(N_pad, 1)

    per_row = pl.pallas_call(
        _ce_row_loss_kernel,
        out_shape=jax.ShapeDtypeStruct((N_pad, 1), jnp.float32),
        grid_spec=pltpu.PrefetchScalarGridSpec(
            num_scalar_prefetch=0,
            grid=(num_tiles,),
            in_specs=[
                pl.BlockSpec((tile_rows, C_pad), lambda i: (i, 0)),
                pl.BlockSpec((tile_rows, 1), lambda i: (i, 0)),
            ],
            out_specs=pl.BlockSpec((tile_rows, 1), lambda i: (i, 0)),
        ),
        compiler_params=pltpu.CompilerParams(
            dimension_semantics=("parallel",),
            vmem_limit_bytes=vmem_limit,
        ),
        cost_estimate=pl.CostEstimate(
            flops=5 * N_pad * C_pad,
            transcendentals=N_pad * C_pad,
            bytes_accessed=N_pad * C_pad * in_bytes + 2 * N_pad * 4,
        ),
    )(logits_p, targets_p)

    # Final reduction / mean in plain JAX (pairwise-accurate, fused by XLA).
    return jnp.sum(per_row[:N, 0]) / jnp.float32(N)


if __name__ == "__main__":
    key = jax.random.PRNGKey(0)
    k1, k2, k3, k4 = jax.random.split(key, 4)

    # primary check (shapes implied by the PyTorch module)
    B, T, C = 2, 8, 32
    logits = jax.random.normal(k1, (B, T, C), dtype=jnp.float32)
    targets = jax.random.randint(k2, (B, T), 0, C, dtype=jnp.int32)

    loss = modified_cross_entropy_loss(logits, targets)
    loss = jax.block_until_ready(loss)

    lf = logits.reshape(B * T, C)
    tf = targets.reshape(B * T)
    ref = -jnp.mean(jax.nn.log_softmax(lf, axis=-1)[jnp.arange(B * T), tf])
    assert jnp.allclose(loss, ref, rtol=1e-5, atol=1e-5), (loss, ref)

    # padding path: row count and class count not multiples of tile granularity
    B2, T2, C2 = 3, 5, 100
    logits2 = jax.random.normal(k3, (B2, T2, C2), dtype=jnp.float32)
    targets2 = jax.random.randint(k4, (B2, T2), 0, C2, dtype=jnp.int32)
    loss2 = jax.block_until_ready(modified_cross_entropy_loss(logits2, targets2))
    lf2 = logits2.reshape(B2 * T2, C2)
    tf2 = targets2.reshape(B2 * T2)
    ref2 = -jnp.mean(jax.nn.log_softmax(lf2, axis=-1)[jnp.arange(B2 * T2), tf2])
    assert jnp.allclose(loss2, ref2, rtol=1e-5, atol=1e-5), (loss2, ref2)

    # bf16 logits stream (half the HBM bytes; math is still f32 in-kernel)
    logits3 = logits.astype(jnp.bfloat16)
    loss3 = jax.block_until_ready(modified_cross_entropy_loss(logits3, targets))
    lf3 = logits3.astype(jnp.float32).reshape(B * T, C)
    ref3 = -jnp.mean(jax.nn.log_softmax(lf3, axis=-1)[jnp.arange(B * T), tf])
    assert jnp.allclose(loss3, ref3, rtol=1e-4, atol=1e-4), (loss3, ref3)

    print("KERNEL_OK")
</pallas_src>

<mosaic_0001>
module attributes {stable_mosaic.version = 11 : i64} {
  func.func @_ce_row_loss_kernel(%arg0: i32, %arg1: memref<16x128xf32, #tpu.memory_space<vmem>>, %arg2: memref<16x1xi32, #tpu.memory_space<vmem>>, %arg3: memref<16x1xf32, #tpu.memory_space<vmem>>) attributes {dimension_semantics = [#tpu.dimension_semantics<parallel>], iteration_bounds = array<i64: 1>, scalar_prefetch = 0 : i64, scratch_operands = 0 : i64, tpu.core_type = #tpu.core_type<tc>, window_params = [{transform_indices = @transform_0, window_bounds = array<i64: 16, 128>}, {transform_indices = @transform_1, window_bounds = array<i64: 16, 1>}, {transform_indices = @transform_2, window_bounds = array<i64: 16, 1>}]} {
    %c0 = arith.constant 0 : index
    %c0_0 = arith.constant 0 : index
    %0 = vector.load %arg1[%c0, %c0_0] : memref<16x128xf32, #tpu.memory_space<vmem>>, vector<16x128xf32>
    %c0_1 = arith.constant 0 : index
    %c0_2 = arith.constant 0 : index
    %1 = vector.load %arg2[%c0_1, %c0_2] : memref<16x1xi32, #tpu.memory_space<vmem>>, vector<16x1xi32>
    %cst = arith.constant dense<0xFF800000> : vector<16xf32>
    %2 = vector.multi_reduction <maximumf>, %0, %cst [1] : vector<16x128xf32> to vector<16xf32>
    %3 = vector.shape_cast %2 : vector<16xf32> to vector<16x1xf32>
    %4 = vector.broadcast %3 : vector<16x1xf32> to vector<16x128xf32>
    %5 = arith.subf %0, %4 : vector<16x128xf32>
    %6 = math.exp %5 : vector<16x128xf32>
    %cst_3 = arith.constant dense<0.000000e+00> : vector<16xf32>
    %7 = vector.multi_reduction <add>, %6, %cst_3 [1] : vector<16x128xf32> to vector<16xf32>
    %8 = vector.shape_cast %7 : vector<16xf32> to vector<16x1xf32>
    %9 = tpu.iota {dimensions = array<i32: 1>} : vector<16x128xi32>
    %10 = vector.broadcast %1 : vector<16x1xi32> to vector<16x128xi32>
    %11 = arith.cmpi eq, %9, %10 : vector<16x128xi32>
    %cst_4 = arith.constant 0.000000e+00 : f32
    %12 = vector.broadcast %cst_4 : f32 to vector<16x128xf32>
    %13 = arith.select %11, %5, %12 : vector<16x128xi1>, vector<16x128xf32>
    %cst_5 = arith.constant dense<0.000000e+00> : vector<16xf32>
    %14 = vector.multi_reduction <add>, %13, %cst_5 [1] : vector<16x128xf32> to vector<16xf32>
    %15 = vector.shape_cast %14 : vector<16xf32> to vector<16x1xf32>
    %16 = math.log %8 : vector<16x1xf32>
    %17 = arith.subf %16, %15 : vector<16x1xf32>
    %c0_6 = arith.constant 0 : index
    %c0_7 = arith.constant 0 : index
    %18 = vector.load %arg3[%c0_6, %c0_7] : memref<16x1xf32, #tpu.memory_space<vmem>>, vector<16x1xf32>
    tpu.vector_store %arg3[%c0_6, %c0_7], %17 {strides = array<i32>} : memref<16x1xf32, #tpu.memory_space<vmem>>, vector<16x1xf32>,
    return
  }
  func.func @transform_0(%arg0: i32) -> (i32, i32) {
    %c0_i32 = arith.constant 0 : i32
    %c0_i32_0 = arith.constant 0 : i32
    return %arg0, %c0_i32 : i32, i32
  }
  func.func @transform_1(%arg0: i32) -> (i32, i32) {
    %c0_i32 = arith.constant 0 : i32
    %c0_i32_0 = arith.constant 0 : i32
    return %arg0, %c0_i32 : i32, i32
  }
  func.func @transform_2(%arg0: i32) -> (i32, i32) {
    %c0_i32 = arith.constant 0 : i32
    %c0_i32_0 = arith.constant 0 : i32
    return %arg0, %c0_i32 : i32, i32
  }
}

</mosaic_0001>

<bundles_post_ra>
// kernel: tpu_custom_call.1
= control target key start
LH: loop header
LB: loop body
LE: loop exit
PB: predicated region body
PF: predicated region fallthrough
CT: control target
= control target key end

     0   :  { %v69_v1 = vmov 0   ;;  %v29_v11 = vlaneseq  ;;  %vm51_vm2 = vcmask 7168   ;;  %s103_s0 = inlined_call_operand.vmem [shape: f32[16,128], index: 0, kind: input, shape index: {}]   ;;  %s104_s1 = inlined_call_operand.vmem [shape: s32[16,1], index: 1, kind: input, shape index: {}]   ;;  %s105_s2 = inlined_call_operand.vmem [shape: f32[16,1], index: 2, kind: output, shape index: {}]  }
   0x1   :  { %v11_v0 = vld [vmem:[%s103_s0] sm:$0xff]  ;;  %59 = vset.pattern.permute.xlu1 %v69_v1  ;;  %60 = vset.pattern.permute.xlu0 %v69_v1  ;;  %v12_v3 = vld [vmem:[%s103_s0 + $0x8] sm:$0xff] }
   0x2   :  { %v13_v2 = vld [vmem:[%s104_s1] sm:$0xff]  ;;  %15 = vmax.xlane.f32.xlu0 %v11_v0  ;;  %v14_v4 = vld [vmem:[%s104_s1 + $0x8] sm:$0xff]  ;;  %v30_v13 = vand.u32 127, %v29_v11 }
   0x3   :  { %32 = vperm.xlu1 %59, %v13_v2  }
   0x6   :  { %17 = vmax.xlane.f32.xlu0 %v12_v3 }
   0x7   :  { %35 = vperm.xlu1 %59, %v14_v4  }
  0x7e   :  { %v33_v12 = vpop.permute.xlu1 %32 }
  0x7f   :  { %vm37_vm0 = vcmp.eq.s32.totalorder %v30_v13, %v33_v12 }
  0x82   :  { %v36_v15 = vpop.permute.xlu1 %35 }
  0x83   :  { %vm38_vm1 = vcmp.eq.s32.totalorder %v30_v13, %v36_v15 }
  0x8b   :  { %v16_v5 = vpop.xlane.xlu0 %15 }
  0x8c   :  { %v19_v6 = vsub.f32 %v11_v0, %v16_v5 }
  0x8e   :  { %v21_v7 = vmul.f32 1.442695, %v19_v6  ;;  %v39_v17 = vsel %vm37_vm0, %v19_v6, 0.0 }
  0x8f   :  { %v18_v8 = vpop.xlane.xlu0 %17 }
  0x90   :  { %61 = vpow2.f32 %v21_v7  ;;  %v20_v9 = vsub.f32 %v12_v3, %v18_v8 }
  0x92   :  { %v23_v10 = vmul.f32 1.442695, %v20_v9  ;;  %v40_v18 = vsel %vm38_vm1, %v20_v9, 0.0 }
  0x94   :  { %63 = vpow2.f32 %v23_v10 }
  0x9d   :  { %v62_v14 = vpop.eup %61 }
  0x9e   :  { %25 = vadd.xlane.f32.xlu0 %v62_v14 }
  0xa1   :  { %v64_v16 = vpop.eup %63 }
  0xa2   :  { %41 = vadd.xlane.f32.xlu0 %v39_v17  ;;  %27 = vadd.xlane.f32.xlu1 %v64_v16 }
  0xa6   :  { %43 = vadd.xlane.f32.xlu0 %v40_v18 }
 0x127   :  { %v26_v19 = vpop.xlane.xlu0 %25 }
 0x128   :  { %65 = vlog2.f32 %v26_v19 }
 0x12b   :  { %v28_v20 = vpop.xlane.xlu1 %27  ;;  %v42_v22 = vpop.xlane.xlu0 %41 }
 0x12c   :  { %67 = vlog2.f32 %v28_v20 }
 0x12f   :  { %v44_v27 = vpop.xlane.xlu0 %43 }
 0x135   :  { %v66_v21 = vpop.eup %65 }
 0x136   :  { %v46_v23 = vmul.f32 0.6931472, %v66_v21 }
 0x138   :  { %v49_v24 = vsub.f32 %v46_v23, %v42_v22 }
 0x139   :  { %v68_v25 = vpop.eup %67 }
 0x13a   :  { %52 = vst.msk [vmem:[%s105_s2] sm:$0xff] %vm51_vm2, %v49_v24  ;;  %v48_v26 = vmul.f32 0.6931472, %v68_v25 }
 0x13c   :  { %v50_v28 = vsub.f32 %v48_v26, %v44_v27 }
 0x13e   :  { %53 = vst.msk [vmem:[%s105_s2 + $0x8] sm:$0xff] %vm51_vm2, %v50_v28 }

</bundles_post_ra>
